<compile_context>
chip_gen: v5e
topology: v5e:2x2
jax: 0.10.0
libtpu: 0.0.40
codegen_flags: <defaults>
</compile_context>

<pallas_src>
import functools

import jax
import jax.numpy as jnp
from jax.experimental import pallas as pl
from jax.experimental.pallas import tpu as pltpu


# -----------------------------------------------------------------------------
# Fused MLP-head kernel.
# Grid = (batch_tiles, k_tiles).  K only tiles the FIRST matmul; layers 2/3 and
# the store run once per batch tile in the final K step.
# -----------------------------------------------------------------------------
def mlp_head_kernel(x_ref, w1_ref, b1_ref, w2_ref, b2_ref, wp_ref, bp_ref,
                    o_ref, acc_ref):
    k = pl.program_id(1)

    @pl.when(k == 0)
    def _init():
        acc_ref[...] = jnp.zeros_like(acc_ref)

    # Layer 1 partial product, f32 accumulation in resident VMEM scratch.
    acc_ref[...] += jnp.dot(x_ref[...], w1_ref[...],
                            preferred_element_type=jnp.float32)

    @pl.when(k == pl.num_programs(1) - 1)
    def _finalize():
        cdt = w2_ref.dtype                      # matmul input dtype (f32 / bf16)
        # Dropout -> Linear -> ReLU   (dropout = identity at inference)
        h1 = jnp.maximum(acc_ref[...] + b1_ref[...], 0.0)
        # Dropout -> Linear -> ReLU
        h2 = jnp.dot(h1.astype(cdt), w2_ref[...],
                     preferred_element_type=jnp.float32) + b2_ref[...]
        h2 = jnp.maximum(h2, 0.0)
        # Dropout -> projection Linear (no activation)
        out = jnp.dot(h2.astype(cdt), wp_ref[...],
                      preferred_element_type=jnp.float32) + bp_ref[...]
        o_ref[...] = out.astype(o_ref.dtype)


def _round_up(x, m):
    return (x + m - 1) // m * m


def _pad2(a, rows, cols):
    r, c = a.shape
    return jnp.pad(a, ((0, rows - r), (0, cols - c)))


def mlp_head(x, w1, b1, w2, b2, wp, bp, *,
             compute_dtype=jnp.bfloat16, batch_tile=256, k_tile=512):
    B, d_in = x.shape
    h1, h2, C = w1.shape[1], w2.shape[1], wp.shape[1]

    # Lane-dense padding: every matmul N dim (and the output) -> multiple of 128.
    H1 = _round_up(h1, 128)
    H2 = _round_up(h2, 128)
    Cp = _round_up(C, 128)
    TK = min(k_tile, _round_up(d_in, 128))
    Kp = _round_up(d_in, TK)
    TB = min(batch_tile, _round_up(B, 8))
    Bp = _round_up(B, TB)

    # Matmul inputs in compute_dtype (bf16 halves DMA bytes + doubles MXU rate
    # on v6e/v7x); biases stay f32 so the elementwise path accumulates in f32.
    xp = _pad2(x.astype(compute_dtype), Bp, Kp)
    w1p = _pad2(w1.astype(compute_dtype), Kp, H1)
    w2p = _pad2(w2.astype(compute_dtype), H1, H2)
    wpp = _pad2(wp.astype(compute_dtype), H2, Cp)
    b1p = _pad2(b1.astype(jnp.float32), 1, H1)
    b2p = _pad2(b2.astype(jnp.float32), 1, H2)
    bpp = _pad2(bp.astype(jnp.float32), 1, Cp)

    nb, nk = Bp // TB, Kp // TK

    itemsize = jnp.dtype(compute_dtype).itemsize
    flops = 2 * B * (d_in * h1 + h1 * h2 + h2 * C)
    bytes_accessed = (
        (xp.size + w1p.size + w2p.size + wpp.size) * itemsize
        + (b1p.size + b2p.size + bpp.size + Bp * Cp) * 4
    )

    out = pl.pallas_call(
        mlp_head_kernel,
        out_shape=jax.ShapeDtypeStruct((Bp, Cp), jnp.float32),
        grid_spec=pltpu.PrefetchScalarGridSpec(
            num_scalar_prefetch=0,
            grid=(nb, nk),
            in_specs=[
                pl.BlockSpec((TB, TK), lambda i, k: (i, k)),   # x   (pipelined)
                pl.BlockSpec((TK, H1), lambda i, k: (k, 0)),   # w1  (K-tiled)
                pl.BlockSpec((1, H1),  lambda i, k: (0, 0)),   # b1  (resident)
                pl.BlockSpec((H1, H2), lambda i, k: (0, 0)),   # w2  (resident)
                pl.BlockSpec((1, H2),  lambda i, k: (0, 0)),   # b2  (resident)
                pl.BlockSpec((H2, Cp), lambda i, k: (0, 0)),   # wp  (resident)
                pl.BlockSpec((1, Cp),  lambda i, k: (0, 0)),   # bp  (resident)
            ],
            out_specs=pl.BlockSpec((TB, Cp), lambda i, k: (i, 0)),
            scratch_shapes=[pltpu.VMEM((TB, H1), jnp.float32)],
        ),
        compiler_params=pltpu.CompilerParams(
            dimension_semantics=("parallel", "arbitrary"),
            vmem_limit_bytes=48 * 1024 * 1024,
        ),
        cost_estimate=pl.CostEstimate(
            flops=flops, transcendentals=0, bytes_accessed=bytes_accessed),
    )(xp, w1p, b1p, w2p, b2p, wpp, bpp)

    return out[:B, :C]


# -----------------------------------------------------------------------------
# Full forward pass.
# -----------------------------------------------------------------------------
@functools.partial(jax.jit, static_argnames=("compute_dtype",))
def dense_text_classifier_forward(data, mask, params, *,
                                  compute_dtype=jnp.bfloat16):
    # data * mask : masked positions become token id 0 (same as PyTorch)
    idx = (data * mask).astype(jnp.int32)                     # (B, S)
    # TODO(synk): embedding gather stays in XLA; Mosaic has no clean vectorized
    # in-kernel gather for arbitrary (B, S) token ids without per-row DMAs.
    embedded = jnp.take(params["embedding"], idx, axis=0)     # (B, S, E)
    B, S, E = embedded.shape
    x = embedded.reshape(B, S * E)                            # flatten(1, 2)

    return mlp_head(
        x,
        params["w1"], params["b1"],
        params["w2"], params["b2"],
        params["wp"], params["bp"],
        compute_dtype=compute_dtype,
    )


# -----------------------------------------------------------------------------
# Deterministic parameter init (shapes from the module __init__ / LazyLinear).
# -----------------------------------------------------------------------------
def init_params(key, emb_input_dim, emb_output_dim, seq_len, dense_units,
                num_classes):
    d_in = seq_len * emb_output_dim
    h1, h2 = dense_units
    keys = jax.random.split(key, 7)

    def uniform(k, shape, fan_in):
        bound = 1.0 / jnp.sqrt(jnp.float32(fan_in))
        return jax.random.uniform(k, shape, jnp.float32, -bound, bound)

    return {
        # nn.Embedding(emb_input_dim, emb_output_dim): N(0,1) init
        "embedding": jax.random.normal(
            keys[0], (emb_input_dim, emb_output_dim), jnp.float32),
        # LazyLinear(dense_units[0]) on flattened (S*E) features
        "w1": uniform(keys[1], (d_in, h1), d_in),
        "b1": uniform(keys[2], (1, h1), d_in),
        # LazyLinear(dense_units[1])
        "w2": uniform(keys[3], (h1, h2), h1),
        "b2": uniform(keys[4], (1, h2), h1),
        # projection LazyLinear(num_classes)
        "wp": uniform(keys[5], (h2, num_classes), h2),
        "bp": uniform(keys[6], (1, num_classes), h2),
    }


if __name__ == "__main__":
    # Small shapes consistent with the module's forward pass.
    B, S = 2, 8                    # batch, sequence length
    VOCAB, E = 50, 16              # emb_input_dim, emb_output_dim
    DENSE_UNITS = [100, 100]       # module defaults
    NUM_CLASSES = 2

    key = jax.random.PRNGKey(0)
    k_params, k_data, k_mask = jax.random.split(key, 3)

    params = init_params(k_params, VOCAB, E, S, DENSE_UNITS, NUM_CLASSES)

    data = jax.random.randint(k_data, (B, S), minval=1, maxval=VOCAB,
                              dtype=jnp.int32)
    mask = jax.random.bernoulli(k_mask, 0.8, (B, S)).astype(jnp.int32)

    # Plain-JAX f32 reference (same math, no Pallas).
    idx = (data * mask).astype(jnp.int32)
    x_ref = jnp.take(params["embedding"], idx, axis=0).reshape(B, S * E)
    h = jnp.maximum(x_ref @ params["w1"] + params["b1"], 0.0)
    h = jnp.maximum(h @ params["w2"] + params["b2"], 0.0)
    ref = h @ params["wp"] + params["bp"]

    # Exact (f32) path.
    out_f32 = jax.block_until_ready(
        dense_text_classifier_forward(data, mask, params,
                                      compute_dtype=jnp.float32))
    assert out_f32.shape == (B, NUM_CLASSES)
    assert jnp.allclose(out_f32, ref, atol=1e-4, rtol=1e-4)

    # Fast (bf16 matmul inputs, f32 accumulation) path.
    out_bf16 = jax.block_until_ready(
        dense_text_classifier_forward(data, mask, params,
                                      compute_dtype=jnp.bfloat16))
    assert out_bf16.shape == (B, NUM_CLASSES)
    assert jnp.allclose(out_bf16, ref, atol=5e-2, rtol=5e-2)

    print("KERNEL_OK")
</pallas_src>

<mosaic_0001>
module attributes {stable_mosaic.version = 11 : i64} {
  func.func @mlp_head_kernel(%arg0: i32, %arg1: i32, %arg2: memref<8x128xf32, #tpu.memory_space<vmem>>, %arg3: memref<128x128xf32, #tpu.memory_space<vmem>>, %arg4: memref<1x128xf32, #tpu.memory_space<vmem>>, %arg5: memref<128x128xf32, #tpu.memory_space<vmem>>, %arg6: memref<1x128xf32, #tpu.memory_space<vmem>>, %arg7: memref<128x128xf32, #tpu.memory_space<vmem>>, %arg8: memref<1x128xf32, #tpu.memory_space<vmem>>, %arg9: memref<8x128xf32, #tpu.memory_space<vmem>>, %arg10: memref<8x128xf32, #tpu.memory_space<vmem>>) attributes {dimension_semantics = [#tpu.dimension_semantics<parallel>, #tpu.dimension_semantics<arbitrary>], iteration_bounds = array<i64: 1, 1>, scalar_prefetch = 0 : i64, scratch_operands = 1 : i64, tpu.core_type = #tpu.core_type<tc>, window_params = [{transform_indices = @transform_0, window_bounds = array<i64: 8, 128>}, {transform_indices = @transform_1, window_bounds = array<i64: 128, 128>}, {pipeline_mode = #tpu.pipeline_mode<synchronous>, transform_indices = @transform_2, window_bounds = array<i64: 1, 128>}, {pipeline_mode = #tpu.pipeline_mode<synchronous>, transform_indices = @transform_3, window_bounds = array<i64: 128, 128>}, {pipeline_mode = #tpu.pipeline_mode<synchronous>, transform_indices = @transform_4, window_bounds = array<i64: 1, 128>}, {pipeline_mode = #tpu.pipeline_mode<synchronous>, transform_indices = @transform_5, window_bounds = array<i64: 128, 128>}, {pipeline_mode = #tpu.pipeline_mode<synchronous>, transform_indices = @transform_6, window_bounds = array<i64: 1, 128>}, {transform_indices = @transform_7, window_bounds = array<i64: 8, 128>}]} {
    %c0_i32 = arith.constant 0 : i32
    %0 = arith.cmpi eq, %arg1, %c0_i32 : i32
    %1 = arith.extui %0 : i1 to i32
    %c0_i32_0 = arith.constant 0 : i32
    %2 = arith.cmpi ne, %1, %c0_i32_0 : i32
    scf.if %2 {
      %cst_10 = arith.constant 0.000000e+00 : f32
      %12 = vector.broadcast %cst_10 : f32 to vector<8x128xf32>
      %c0_11 = arith.constant 0 : index
      %c0_12 = arith.constant 0 : index
      %13 = vector.load %arg10[%c0_11, %c0_12] : memref<8x128xf32, #tpu.memory_space<vmem>>, vector<8x128xf32>
      tpu.vector_store %arg10[%c0_11, %c0_12], %12 {strides = array<i32>} : memref<8x128xf32, #tpu.memory_space<vmem>>, vector<8x128xf32>,
    } else {
    }
    %c0 = arith.constant 0 : index
    %c0_1 = arith.constant 0 : index
    %3 = vector.load %arg10[%c0, %c0_1] : memref<8x128xf32, #tpu.memory_space<vmem>>, vector<8x128xf32>
    %c0_2 = arith.constant 0 : index
    %c0_3 = arith.constant 0 : index
    %4 = vector.load %arg2[%c0_2, %c0_3] : memref<8x128xf32, #tpu.memory_space<vmem>>, vector<8x128xf32>
    %c0_4 = arith.constant 0 : index
    %c0_5 = arith.constant 0 : index
    %5 = vector.load %arg3[%c0_4, %c0_5] : memref<128x128xf32, #tpu.memory_space<vmem>>, vector<128x128xf32>
    %cst = arith.constant dense<0.000000e+00> : vector<8x128xf32>
    %6 = tpu.matmul %4, %5, %cst {dimension_numbers = #tpu.dot_dimension_numbers<[1], [0], [0], [1], [0, 0, 1, 1], [], []>} : vector<8x128xf32>, vector<128x128xf32>, vector<8x128xf32> -> vector<8x128xf32>
    %7 = arith.addf %3, %6 : vector<8x128xf32>
    %c0_6 = arith.constant 0 : index
    %c0_7 = arith.constant 0 : index
    %8 = vector.load %arg10[%c0_6, %c0_7] : memref<8x128xf32, #tpu.memory_space<vmem>>, vector<8x128xf32>
    tpu.vector_store %arg10[%c0_6, %c0_7], %7 {strides = array<i32>} : memref<8x128xf32, #tpu.memory_space<vmem>>, vector<8x128xf32>,
    %c0_i32_8 = arith.constant 0 : i32
    %9 = arith.cmpi eq, %arg1, %c0_i32_8 : i32
    %10 = arith.extui %9 : i1 to i32
    %c0_i32_9 = arith.constant 0 : i32
    %11 = arith.cmpi ne, %10, %c0_i32_9 : i32
    scf.if %11 {
      %c0_10 = arith.constant 0 : index
      %c0_11 = arith.constant 0 : index
      %12 = vector.load %arg10[%c0_10, %c0_11] : memref<8x128xf32, #tpu.memory_space<vmem>>, vector<8x128xf32>
      %c0_12 = arith.constant 0 : index
      %c0_13 = arith.constant 0 : index
      %13 = vector.load %arg4[%c0_12, %c0_13] : memref<1x128xf32, #tpu.memory_space<vmem>>, vector<1x128xf32>
      %14 = vector.broadcast %13 : vector<1x128xf32> to vector<8x128xf32>
      %15 = arith.addf %12, %14 : vector<8x128xf32>
      %cst_14 = arith.constant 0.000000e+00 : f32
      %16 = vector.broadcast %cst_14 : f32 to vector<8x128xf32>
      %17 = arith.maximumf %15, %16 : vector<8x128xf32>
      %c0_15 = arith.constant 0 : index
      %c0_16 = arith.constant 0 : index
      %18 = vector.load %arg5[%c0_15, %c0_16] : memref<128x128xf32, #tpu.memory_space<vmem>>, vector<128x128xf32>
      %cst_17 = arith.constant dense<0.000000e+00> : vector<8x128xf32>
      %19 = tpu.matmul %17, %18, %cst_17 {dimension_numbers = #tpu.dot_dimension_numbers<[1], [0], [0], [1], [0, 0, 1, 1], [], []>} : vector<8x128xf32>, vector<128x128xf32>, vector<8x128xf32> -> vector<8x128xf32>
      %c0_18 = arith.constant 0 : index
      %c0_19 = arith.constant 0 : index
      %20 = vector.load %arg6[%c0_18, %c0_19] : memref<1x128xf32, #tpu.memory_space<vmem>>, vector<1x128xf32>
      %21 = vector.broadcast %20 : vector<1x128xf32> to vector<8x128xf32>
      %22 = arith.addf %19, %21 : vector<8x128xf32>
      %cst_20 = arith.constant 0.000000e+00 : f32
      %23 = vector.broadcast %cst_20 : f32 to vector<8x128xf32>
      %24 = arith.maximumf %22, %23 : vector<8x128xf32>
      %c0_21 = arith.constant 0 : index
      %c0_22 = arith.constant 0 : index
      %25 = vector.load %arg7[%c0_21, %c0_22] : memref<128x128xf32, #tpu.memory_space<vmem>>, vector<128x128xf32>
      %cst_23 = arith.constant dense<0.000000e+00> : vector<8x128xf32>
      %26 = tpu.matmul %24, %25, %cst_23 {dimension_numbers = #tpu.dot_dimension_numbers<[1], [0], [0], [1], [0, 0, 1, 1], [], []>} : vector<8x128xf32>, vector<128x128xf32>, vector<8x128xf32> -> vector<8x128xf32>
      %c0_24 = arith.constant 0 : index
      %c0_25 = arith.constant 0 : index
      %27 = vector.load %arg8[%c0_24, %c0_25] : memref<1x128xf32, #tpu.memory_space<vmem>>, vector<1x128xf32>
      %28 = vector.broadcast %27 : vector<1x128xf32> to vector<8x128xf32>
      %29 = arith.addf %26, %28 : vector<8x128xf32>
      %c0_26 = arith.constant 0 : index
      %c0_27 = arith.constant 0 : index
      %30 = vector.load %arg9[%c0_26, %c0_27] : memref<8x128xf32, #tpu.memory_space<vmem>>, vector<8x128xf32>
      tpu.vector_store %arg9[%c0_26, %c0_27], %29 {strides = array<i32>} : memref<8x128xf32, #tpu.memory_space<vmem>>, vector<8x128xf32>,
    } else {
    }
    return
  }
  func.func @transform_0(%arg0: i32, %arg1: i32) -> (i32, i32) {
    %c0_i32 = arith.constant 0 : i32
    return %arg0, %arg1 : i32, i32
  }
  func.func @transform_1(%arg0: i32, %arg1: i32) -> (i32, i32) {
    %c0_i32 = arith.constant 0 : i32
    %c0_i32_0 = arith.constant 0 : i32
    return %arg1, %c0_i32 : i32, i32
  }
  func.func @transform_2(%arg0: i32, %arg1: i32) -> (i32, i32) {
    %c0_i32 = arith.constant 0 : i32
    %c0_i32_0 = arith.constant 0 : i32
    %c0_i32_1 = arith.constant 0 : i32
    return %c0_i32, %c0_i32_0 : i32, i32
  }
  func.func @transform_3(%arg0: i32, %arg1: i32) -> (i32, i32) {
    %c0_i32 = arith.constant 0 : i32
    %c0_i32_0 = arith.constant 0 : i32
    %c0_i32_1 = arith.constant 0 : i32
    return %c0_i32, %c0_i32_0 : i32, i32
  }
  func.func @transform_4(%arg0: i32, %arg1: i32) -> (i32, i32) {
    %c0_i32 = arith.constant 0 : i32
    %c0_i32_0 = arith.constant 0 : i32
    %c0_i32_1 = arith.constant 0 : i32
    return %c0_i32, %c0_i32_0 : i32, i32
  }
  func.func @transform_5(%arg0: i32, %arg1: i32) -> (i32, i32) {
    %c0_i32 = arith.constant 0 : i32
    %c0_i32_0 = arith.constant 0 : i32
    %c0_i32_1 = arith.constant 0 : i32
    return %c0_i32, %c0_i32_0 : i32, i32
  }
  func.func @transform_6(%arg0: i32, %arg1: i32) -> (i32, i32) {
    %c0_i32 = arith.constant 0 : i32
    %c0_i32_0 = arith.constant 0 : i32
    %c0_i32_1 = arith.constant 0 : i32
    return %c0_i32, %c0_i32_0 : i32, i32
  }
  func.func @transform_7(%arg0: i32, %arg1: i32) -> (i32, i32) {
    %c0_i32 = arith.constant 0 : i32
    %c0_i32_0 = arith.constant 0 : i32
    return %arg0, %c0_i32 : i32, i32
  }
}

</mosaic_0001>

<bundles_post_ra>
// kernel: dense_text_classifier_forward.1
= control target key start
LH: loop header
LB: loop body
LE: loop exit
PB: predicated region body
PF: predicated region fallthrough
CT: control target
= control target key end

     0   :  { %s369_s1 = inlined_call_operand.vmem [shape: f32[128,128], index: 1, kind: input, shape index: {}]   ;;  %s370_s3 = inlined_call_operand.vmem [shape: f32[128,128], index: 3, kind: input, shape index: {}]   ;;  %s371_s2 = inlined_call_operand.vmem [shape: f32[1,128], index: 2, kind: input, shape index: {}]   ;;  %s372_s0 = inlined_call_operand.vmem [shape: f32[8,128], index: 0, kind: input, shape index: {}]   ;;  %s373_s4 = inlined_call_operand.vmem [shape: f32[1,128], index: 4, kind: input, shape index: {}]   ;;  %s374_s5 = inlined_call_operand.vmem [shape: f32[128,128], index: 5, kind: input, shape index: {}]   ;;  %s375_s6 = inlined_call_operand.vmem [shape: f32[1,128], index: 6, kind: input, shape index: {}]   ;;  %s376_s7 = inlined_call_operand.vmem [shape: f32[8,128], index: 7, kind: output, shape index: {}]  }
   0x1   :  { %v48_v0 = vld [vmem:[%s369_s1 + $0x78] sm:$0xff]  ;;  %v47_v1 = vld [vmem:[%s369_s1 + $0x70] sm:$0xff]  ;;  %v46_v2 = vld [vmem:[%s369_s1 + $0x68] sm:$0xff] }
   0x2   :  { %49 = vmatpush.msra.mxu0 %v48_v0  ;;  %v45_v3 = vld [vmem:[%s369_s1 + $0x60] sm:$0xff]  ;;  %v96_v4 = vld [vmem:[%s370_s3 + $0x78] sm:$0xff]  ;;  %v95_v6 = vld [vmem:[%s370_s3 + $0x70] sm:$0xff] }
   0x3   :  { %v44_v5 = vld [vmem:[%s369_s1 + $0x58] sm:$0xff]  ;;  %101 = vmatpush.msra.mxu1 %v96_v4  ;;  %v94_v7 = vld [vmem:[%s370_s3 + $0x68] sm:$0xff]  ;;  %v43_v8 = vld [vmem:[%s369_s1 + $0x50] sm:$0xff] }
   0x4   :  { %50 = vmatpush.msra.mxu0 %v47_v1  ;;  %v93_v9 = vld [vmem:[%s370_s3 + $0x60] sm:$0xff]  ;;  %v42_v10 = vld [vmem:[%s369_s1 + $0x48] sm:$0xff]  ;;  %v92_v11 = vld [vmem:[%s370_s3 + $0x58] sm:$0xff] }
   0x5   :  { %102 = vmatpush.msra.mxu1 %v95_v6  ;;  %v41_v12 = vld [vmem:[%s369_s1 + $0x40] sm:$0xff]  ;;  %v91_v13 = vld [vmem:[%s370_s3 + $0x50] sm:$0xff]  ;;  %v40_v14 = vld [vmem:[%s369_s1 + $0x38] sm:$0xff] }
   0x6   :  { %51 = vmatpush.msra.mxu0 %v46_v2  ;;  %v90_v15 = vld [vmem:[%s370_s3 + $0x48] sm:$0xff]  ;;  %v39_v16 = vld [vmem:[%s369_s1 + $0x30] sm:$0xff]  ;;  %v89_v17 = vld [vmem:[%s370_s3 + $0x40] sm:$0xff] }
   0x7   :  { %103 = vmatpush.msra.mxu1 %v94_v7  ;;  %v38_v18 = vld [vmem:[%s369_s1 + $0x28] sm:$0xff]  ;;  %v88_v19 = vld [vmem:[%s370_s3 + $0x38] sm:$0xff]  ;;  %v37_v20 = vld [vmem:[%s369_s1 + $0x20] sm:$0xff] }
   0x8   :  { %52 = vmatpush.msra.mxu0 %v45_v3  ;;  %v87_v21 = vld [vmem:[%s370_s3 + $0x30] sm:$0xff]  ;;  %v36_v22 = vld [vmem:[%s369_s1 + $0x18] sm:$0xff]  ;;  %v86_v23 = vld [vmem:[%s370_s3 + $0x28] sm:$0xff] }
   0x9   :  { %104 = vmatpush.msra.mxu1 %v93_v9  ;;  %v35_v24 = vld [vmem:[%s369_s1 + $0x10] sm:$0xff]  ;;  %v85_v25 = vld [vmem:[%s370_s3 + $0x20] sm:$0xff]  ;;  %v34_v26 = vld [vmem:[%s369_s1 + $0x8] sm:$0xff] }
   0xa   :  { %53 = vmatpush.msra.mxu0 %v44_v5  ;;  %v84_v27 = vld [vmem:[%s370_s3 + $0x18] sm:$0xff]  ;;  %v33_v28 = vld [vmem:[%s369_s1] sm:$0xff]  ;;  %v83_v30 = vld [vmem:[%s370_s3 + $0x10] sm:$0xff] }
   0xb   :  { %105 = vmatpush.msra.mxu1 %v92_v11  ;;  %v32_v29 = vld [vmem:[%s372_s0] sm:$0xff]  ;;  %v82_v31 = vld [vmem:[%s370_s3 + $0x8] sm:$0xff]  ;;  %v137_v33 = vld [vmem:[%s374_s5 + $0x78] sm:$0xff] }
   0xc   :  { %54 = vmatpush.msra.mxu0 %v43_v8  ;;  %v81_v32 = vld [vmem:[%s370_s3] sm:$0xff]  ;;  %v136_v34 = vld [vmem:[%s374_s5 + $0x70] sm:$0xff]  ;;  %142 = vmatpush.msra.mxu2 %v137_v33  ;;  %v135_v35 = vld [vmem:[%s374_s5 + $0x68] sm:$0xff] }
   0xd   :  { %106 = vmatpush.msra.mxu1 %v91_v13  ;;  %v134_v36 = vld [vmem:[%s374_s5 + $0x60] sm:$0xff]  ;;  %v133_v37 = vld [vmem:[%s374_s5 + $0x58] sm:$0xff]  ;;  %v132_v38 = vld [vmem:[%s374_s5 + $0x50] sm:$0xff] }
   0xe   :  { %55 = vmatpush.msra.mxu0 %v42_v10  ;;  %143 = vmatpush.msra.mxu2 %v136_v34  ;;  %v131_v39 = vld [vmem:[%s374_s5 + $0x48] sm:$0xff]  ;;  %v130_v40 = vld [vmem:[%s374_s5 + $0x40] sm:$0xff]  ;;  %v129_v41 = vld [vmem:[%s374_s5 + $0x38] sm:$0xff] }
   0xf   :  { %107 = vmatpush.msra.mxu1 %v90_v15  ;;  %v128_v42 = vld [vmem:[%s374_s5 + $0x30] sm:$0xff]  ;;  %v127_v43 = vld [vmem:[%s374_s5 + $0x28] sm:$0xff]  ;;  %v126_v44 = vld [vmem:[%s374_s5 + $0x20] sm:$0xff] }
  0x10   :  { %56 = vmatpush.msra.mxu0 %v41_v12  ;;  %144 = vmatpush.msra.mxu2 %v135_v35  ;;  %v125_v45 = vld [vmem:[%s374_s5 + $0x18] sm:$0xff]  ;;  %v167_v46 = vld [vmem:[%s371_s2] ss:$0 sm:$0xff]  ;;  %v124_v50 = vld [vmem:[%s374_s5 + $0x10] sm:$0xff] }
  0x11   :  { %108 = vmatpush.msra.mxu1 %v89_v17  ;;  %v123_v51 = vld [vmem:[%s374_s5 + $0x8] sm:$0xff]  ;;  %v122_v52 = vld [vmem:[%s374_s5] sm:$0xff] }
  0x12   :  { %57 = vmatpush.msra.mxu0 %v40_v14  ;;  %145 = vmatpush.msra.mxu2 %v134_v36  ;;  %v168_v53 = vld [vmem:[%s373_s4] ss:$0 sm:$0xff] }
  0x13   :  { %109 = vmatpush.msra.mxu1 %v88_v19  ;;  %v169_v57 = vld [vmem:[%s375_s6] ss:$0 sm:$0xff] }
  0x14   :  { %58 = vmatpush.msra.mxu0 %v39_v16  ;;  %146 = vmatpush.msra.mxu2 %v133_v37 }
  0x15   :  { %110 = vmatpush.msra.mxu1 %v87_v21 }
  0x16   :  { %59 = vmatpush.msra.mxu0 %v38_v18  ;;  %147 = vmatpush.msra.mxu2 %v132_v38 }
  0x17   :  { %111 = vmatpush.msra.mxu1 %v86_v23 }
  0x18   :  { %60 = vmatpush.msra.mxu0 %v37_v20  ;;  %148 = vmatpush.msra.mxu2 %v131_v39 }
  0x19   :  { %112 = vmatpush.msra.mxu1 %v85_v25 }
  0x1a   :  { %61 = vmatpush.msra.mxu0 %v36_v22  ;;  %149 = vmatpush.msra.mxu2 %v130_v40 }
  0x1b   :  { %113 = vmatpush.msra.mxu1 %v84_v27 }
  0x1c   :  { %62 = vmatpush.msra.mxu0 %v35_v24  ;;  %150 = vmatpush.msra.mxu2 %v129_v41 }
  0x1d   :  { %114 = vmatpush.msra.mxu1 %v83_v30 }
  0x1e   :  { %63 = vmatpush.msra.mxu0 %v34_v26  ;;  %151 = vmatpush.msra.mxu2 %v128_v42 }
  0x1f   :  { %115 = vmatpush.msra.mxu1 %v82_v31 }
  0x20   :  { %64 = vmatpush.msra.mxu0 %v33_v28  ;;  %152 = vmatpush.msra.mxu2 %v127_v43 }
  0x21   :  { %65 = vmatmul.f32.vlgmr.msra.gmra.mxu0 %v32_v29  ;;  %116 = vmatpush.msra.mxu1 %v81_v32 }
  0x22   :  { %153 = vmatpush.msra.mxu2 %v126_v44 }
  0x24   :  { %154 = vmatpush.msra.mxu2 %v125_v45 }
  0x26   :  { %155 = vmatpush.msra.mxu2 %v124_v50 }
  0x28   :  { %156 = vmatpush.msra.mxu2 %v123_v51 }
  0x2a   :  { %157 = vmatpush.msra.mxu2 %v122_v52 }
  0x9e   :  { %v66_v47 = vpop.f32.mrf.mxu0 }
  0x9f   :  { %v79_v48 = vadd.f32 %v167_v46, %v66_v47 }
  0xa1   :  { %v80_v49 = vmax.f32 %v79_v48, 0.0 }
  0xa3   :  { %117 = vmatmul.f32.vlgmr.msra.gmra.mxu1 %v80_v49 }
 0x120   :  { %v118_v54 = vpop.f32.mrf.mxu1 }
 0x121   :  { %v119_v55 = vadd.f32 %v168_v53, %v118_v54 }
 0x123   :  { %v121_v56 = vmax.f32 %v119_v55, 0.0 }
 0x125   :  { %158 = vmatmul.f32.vlgmr.msra.gmra.mxu2 %v121_v56 }
 0x1a8   :  { %v159_v58 = vpop.f32.mrf.mxu2 }
 0x1a9   :  { %v160_v59 = vadd.f32 %v169_v57, %v159_v58 }
 0x1ab   :  { %162 = vst [vmem:[%s376_s7] sm:$0xff] %v160_v59 }

</bundles_post_ra>
